<compile_context>
chip_gen: v6e
topology: v6e:2x2x1
jax: 0.10.0
libtpu: 0.0.40
codegen_flags: <defaults>
</compile_context>

<pallas_src>
import functools
import math

import jax
import jax.numpy as jnp
from jax.experimental import pallas as pl
from jax.experimental.pallas import tpu as pltpu

_EPS = 1e-9


# ---------------------------------------------------------------------------
# Polynomial evaluation (same power tree / EPS-skip semantics as the PyTorch
# PolynomialEvaluator, with the constant term folded in as a scalar add).
# Coeffs are Python floats baked in at trace time.
# ---------------------------------------------------------------------------
def _poly_eval(x, coeffs, eps=_EPS):
    n = len(coeffs)
    powers = [None] * n

    def pow_(i):  # i >= 1 here; repeated-squaring power tree with memoization
        if powers[i] is None:
            if i == 1:
                powers[i] = x
            else:
                half = pow_(i // 2)
                full = half * half
                if i % 2 == 1:
                    full = full * x
                powers[i] = full
        return powers[i]

    indices = [i for i in range(n) if abs(coeffs[i]) > eps]

    ans = None
    for i in indices:
        if i == 0:
            continue  # constant term handled as a scalar add below
        term = coeffs[i] * pow_(i)
        ans = term if ans is None else ans + term

    if 0 in indices:
        # scalar add: avoids materializing a ones() vreg and an extra vmul
        ans = (ans + coeffs[0]) if ans is not None else jnp.full_like(x, coeffs[0])

    if ans is None:
        ans = jnp.zeros_like(x)
    return ans


def _apply_poly_relu(x, coeffs, clip, clip_range, training, out_dtype):
    """clip (train-time) + polynomial in f32, cast back to out_dtype."""
    xf = x.astype(jnp.float32) if x.dtype != jnp.float32 else x
    if clip and training:
        xf = jnp.clip(xf, -clip_range, clip_range)
    return _poly_eval(xf, coeffs).astype(out_dtype)


# ---------------------------------------------------------------------------
# Pallas kernel: elementwise polynomial activation (+ optional train-time clip)
# ---------------------------------------------------------------------------
def _poly_relu_kernel(x_ref, o_ref, *, coeffs, clip, clip_range, training):
    o_ref[...] = _apply_poly_relu(
        x_ref[...], coeffs, clip, clip_range, training, o_ref.dtype
    )


# ---------------------------------------------------------------------------
# Layout / tiling: lane-dense slab + ~4 MiB row tiles with a cdiv grid
# (ragged last block masked by Pallas — no divisibility requirement on rows).
# ---------------------------------------------------------------------------
def _choose_tiling(total, itemsize, target_block_bytes):
    # widest lane dim (multiple of 128, capped at 4096) that divides the total
    lane = 128
    for cand in (4096, 2048, 1024, 512, 256, 128):
        if total % cand == 0:
            lane = cand
            break
    rows = total // lane

    # rows per tile: multiple of 8 closest to target_block_bytes, >= 8
    target_rows = max(8, (target_block_bytes // (lane * itemsize)) // 8 * 8)
    if rows <= target_rows:
        # whole slab is one (small, <= target_block_bytes) block; block shape
        # equals full array dims so any row count is legal.
        tile_rows = rows
    else:
        tile_rows = target_rows  # multiple of 8; last block handled via cdiv grid
    return rows, lane, tile_rows


def poly_relu(x, coeffs, *, clip=False, clip_range=5.0, training=False,
              target_block_bytes=4 << 20):
    """PolyRelu forward. x: any shape (module uses NCHW), float32/bf16."""
    coeffs = tuple(float(c) for c in coeffs)
    orig_shape = x.shape
    orig_dtype = x.dtype
    total = math.prod(orig_shape)
    if total == 0:
        return x

    flat = x.reshape(-1)

    # 128-aligned prefix runs through the kernel; the (rare, <128 element)
    # tail is finished with plain jnp — avoids pad + slice full-HBM passes.
    main = (total // 128) * 128
    tail = total - main

    if main == 0:
        out = _apply_poly_relu(flat, coeffs, clip, clip_range, training, orig_dtype)
        return out.reshape(orig_shape)

    itemsize = jnp.dtype(orig_dtype).itemsize
    rows, lane, tile_rows = _choose_tiling(main, itemsize, target_block_bytes)
    x2d = (flat[:main] if tail else flat).reshape(rows, lane)

    kernel = functools.partial(
        _poly_relu_kernel,
        coeffs=coeffs,
        clip=clip,
        clip_range=float(clip_range),
        training=training,
    )

    # Advisory cost: ~a handful of VPU flops per element, pure streaming I/O.
    n_nonzero = sum(1 for c in coeffs if abs(c) > _EPS)
    deg = max((i for i, c in enumerate(coeffs) if abs(c) > _EPS), default=0)
    flops_per_elem = 2 * n_nonzero + max(deg, 1).bit_length() + (2 if clip and training else 0)
    cost = pl.CostEstimate(
        flops=flops_per_elem * main,
        transcendentals=0,
        bytes_accessed=2 * main * itemsize,
    )

    out2d = pl.pallas_call(
        kernel,
        out_shape=jax.ShapeDtypeStruct((rows, lane), orig_dtype),
        grid=(pl.cdiv(rows, tile_rows),),
        in_specs=[pl.BlockSpec((tile_rows, lane), lambda i: (i, 0))],
        out_specs=pl.BlockSpec((tile_rows, lane), lambda i: (i, 0)),
        compiler_params=pltpu.CompilerParams(
            dimension_semantics=("parallel",),
            # 2x in + 2x out buffers at ~4 MiB each = 16 MiB; 32 MiB leaves
            # headroom on every generation (v5e scoped default is only 16 MiB,
            # v7x physical VMEM is 64 MiB).
            vmem_limit_bytes=32 * 1024 * 1024,
        ),
        cost_estimate=cost,
    )(x2d)

    out_flat = out2d.reshape(-1)
    if tail:
        tail_out = _apply_poly_relu(
            flat[main:], coeffs, clip, clip_range, training, orig_dtype
        )
        out_flat = jnp.concatenate([out_flat, tail_out])
    return out_flat.reshape(orig_shape)


# ---------------------------------------------------------------------------
# Reference (pure JAX) mirroring the PyTorch module exactly (including the
# ones_like constant term), for correctness checking.
# ---------------------------------------------------------------------------
def poly_relu_ref(x, coeffs, *, clip=False, clip_range=5.0, training=False, eps=_EPS):
    if clip and training:
        x = jnp.clip(x, -clip_range, clip_range)

    n = len(coeffs)
    powers = [None] * n

    def pow_(i):
        if powers[i] is None:
            if i == 0:
                powers[i] = jnp.ones_like(x)
            elif i == 1:
                powers[i] = x
            else:
                half = pow_(i // 2)
                full = half * half
                if i % 2 == 1:
                    full = full * x
                powers[i] = full
        return powers[i]

    indices = [i for i in range(n) if abs(coeffs[i]) > eps]
    ans = None
    for i in indices:
        term = coeffs[i] * pow_(i)
        ans = term if ans is None else ans + term
    return ans if ans is not None else jnp.zeros_like(x)


if __name__ == "__main__":
    # Degree-4 polynomial "smooth ReLU" approximation; coeff[3] == 0 exercises
    # the EPS-based coefficient skipping.
    coeffs = [0.25, 0.5, 0.125, 0.0, 0.01]

    key = jax.random.PRNGKey(0)
    k0, k1, k2 = jax.random.split(key, 3)

    # 1) Eval-mode PolyRelu on the module's typical NCHW input.
    x = jax.random.normal(k0, (2, 4, 16, 16), dtype=jnp.float32)
    out = jax.block_until_ready(poly_relu(x, coeffs, clip=True, clip_range=5.0, training=False))
    ref = poly_relu_ref(x, coeffs, clip=True, clip_range=5.0, training=False)
    assert out.shape == x.shape and out.dtype == x.dtype
    assert jnp.allclose(out, ref, atol=1e-5, rtol=1e-5)

    # 2) Training-mode path (exercises the clip branch).
    out_t = jax.block_until_ready(poly_relu(10.0 * x, coeffs, clip=True, clip_range=5.0, training=True))
    ref_t = poly_relu_ref(10.0 * x, coeffs, clip=True, clip_range=5.0, training=True)
    assert jnp.allclose(out_t, ref_t, atol=1e-5, rtol=1e-5)

    # 3) Multi-block cdiv grid with a ragged (masked) last block:
    #    total = 13312 -> lane=1024, rows=13; tiny block target forces grid=2.
    x_r = jax.random.normal(k1, (2, 4, 16, 104), dtype=jnp.float32)
    out_r = jax.block_until_ready(
        poly_relu(x_r, coeffs, target_block_bytes=8 * 1024 * 4)
    )
    assert jnp.allclose(out_r, poly_relu_ref(x_r, coeffs), atol=1e-5, rtol=1e-5)

    # 4) Non-128-multiple element count: kernel on the aligned prefix,
    #    jnp tail for the remaining <128 elements.
    x_o = jax.random.normal(k2, (2, 3, 5, 9), dtype=jnp.float32)  # 270 elements
    out_o = jax.block_until_ready(poly_relu(x_o, coeffs))
    assert jnp.allclose(out_o, poly_relu_ref(x_o, coeffs), atol=1e-5, rtol=1e-5)

    # TODO(synk): regularize / monitor branches only stash the raw input into
    # Python class-level buffers (no tensor math) — no Pallas equivalent needed;
    # they don't affect the returned value.
    print("KERNEL_OK")
</pallas_src>

<mosaic_0001>
module attributes {stable_mosaic.version = 11 : i64} {
  func.func @_poly_relu_kernel(%arg0: i32, %arg1: memref<1x2048xf32, #tpu.memory_space<vmem>>, %arg2: memref<1x2048xf32, #tpu.memory_space<vmem>>) attributes {dimension_semantics = [#tpu.dimension_semantics<parallel>], iteration_bounds = array<i64: 1>, scalar_prefetch = 0 : i64, scratch_operands = 0 : i64, tpu.core_type = #tpu.core_type<tc>, window_params = [{transform_indices = @transform_0, window_bounds = array<i64: 1, 2048>}, {transform_indices = @transform_1, window_bounds = array<i64: 1, 2048>}]} {
    %c0 = arith.constant 0 : index
    %c0_0 = arith.constant 0 : index
    %0 = vector.load %arg1[%c0, %c0_0] : memref<1x2048xf32, #tpu.memory_space<vmem>>, vector<1x2048xf32>
    %cst = arith.constant 5.000000e-01 : f32
    %1 = vector.broadcast %cst : f32 to vector<1x2048xf32>
    %2 = arith.mulf %1, %0 : vector<1x2048xf32>
    %3 = arith.mulf %0, %0 : vector<1x2048xf32>
    %cst_1 = arith.constant 1.250000e-01 : f32
    %4 = vector.broadcast %cst_1 : f32 to vector<1x2048xf32>
    %5 = arith.mulf %4, %3 : vector<1x2048xf32>
    %6 = arith.addf %2, %5 : vector<1x2048xf32>
    %7 = arith.mulf %3, %3 : vector<1x2048xf32>
    %cst_2 = arith.constant 0.00999999977 : f32
    %8 = vector.broadcast %cst_2 : f32 to vector<1x2048xf32>
    %9 = arith.mulf %8, %7 : vector<1x2048xf32>
    %10 = arith.addf %6, %9 : vector<1x2048xf32>
    %cst_3 = arith.constant 2.500000e-01 : f32
    %11 = vector.broadcast %cst_3 : f32 to vector<1x2048xf32>
    %12 = arith.addf %10, %11 : vector<1x2048xf32>
    %c0_4 = arith.constant 0 : index
    %c0_5 = arith.constant 0 : index
    %13 = vector.load %arg2[%c0_4, %c0_5] : memref<1x2048xf32, #tpu.memory_space<vmem>>, vector<1x2048xf32>
    tpu.vector_store %arg2[%c0_4, %c0_5], %12 {strides = array<i32>} : memref<1x2048xf32, #tpu.memory_space<vmem>>, vector<1x2048xf32>,
    return
  }
  func.func @transform_0(%arg0: i32) -> (i32, i32) {
    %c0_i32 = arith.constant 0 : i32
    %c0_i32_0 = arith.constant 0 : i32
    return %arg0, %c0_i32 : i32, i32
  }
  func.func @transform_1(%arg0: i32) -> (i32, i32) {
    %c0_i32 = arith.constant 0 : i32
    %c0_i32_0 = arith.constant 0 : i32
    return %arg0, %c0_i32 : i32, i32
  }
}

</mosaic_0001>

<bundles_post_ra>
// kernel: tpu_custom_call.1
= control target key start
LH: loop header
LB: loop body
LE: loop exit
PB: predicated region body
PF: predicated region fallthrough
CT: control target
= control target key end

     0   :  { %6 = vsyncpa [#allocation3], 0  ;;  %s120_s0 = inlined_call_operand.hbm [shape: f32[1,2048], index: 0, kind: input, shape index: {}]   ;;  %s121_s1 = inlined_call_operand.hbm [shape: f32[1,2048], index: 1, kind: output, shape index: {}]  }
   0x1   :  { %7 = vsyncpa [#allocation4], 0  ;;  %s102_s6 = smov [#allocation2]  }
   0x2   :  { %s14_s7 = sshll.u32 %s102_s6, 4  ;;  %s15_s7 = int_to_ptr.vmem [resolvable:$true] %s14_s7 }
   0x3   :  { %s66_s8 = scalar_lea.vmem %s15_s7, 256  ;;  %p71_p1 = scmp.lt.s32.totalorder %s15_s7, %s15_s7 }
   0x4   :  { %p67_p0 = scmp.ne.s32.totalorder %s15_s7, %s66_s8  ;;  %p72_p2 = scmp.lt.s32.totalorder %s66_s8, %s66_s8 }
   0x6   :  { %p73_p3 = por %p72_p2, %p71_p1 }
   0x8   :  { %p74_p4 = pnand %p73_p3, %p67_p0 }
   0xa   :  { %77 = shalt.err (!%p74_p4)
}
   0xb   :  { %17 = dma.hbm_to_vmem [thread:$0]  %s120_s0, 256, %s15_s7, [#allocation3]  }
   0xc   :  { %98 = dma.done.wait [#allocation3], 256  }
   0xd   :  { %99 = vsyncadd [#allocation3], 4294967040  ;;  %v21_v0 = vld [vmem:[#allocation2] sm:$0xff]  ;;  %v22_v1 = vld [vmem:[#allocation2 + $0x8] sm:$0xff]  ;;  %s103_s11 = smov [#allocation5]  }
   0xe   :  { %v23_v2 = vmul.f32 0.5, %v21_v0  ;;  %v25_v3 = vmul.f32 %v21_v0, %v21_v0  ;;  %v24_v4 = vmul.f32 0.5, %v22_v1  ;;  %v26_v5 = vmul.f32 %v22_v1, %v22_v1  ;;  %s47_s12 = sshll.u32 %s103_s11, 4  ;;  %s48_s12 = int_to_ptr.vmem [resolvable:$true] %s47_s12 }
   0xf   :  { %s78_s0 = scalar_lea.vmem %s48_s12, 256  ;;  %p83_p6 = scmp.lt.s32.totalorder %s48_s12, %s48_s12 }
  0x10   :  { %v27_v6 = vmul.f32 0.125, %v25_v3  ;;  %v31_v7 = vmul.f32 %v25_v3, %v25_v3  ;;  %v28_v8 = vmul.f32 0.125, %v26_v5  ;;  %v32_v9 = vmul.f32 %v26_v5, %v26_v5  ;;  %p79_p5 = scmp.ne.s32.totalorder %s48_s12, %s78_s0  ;;  %p84_p7 = scmp.lt.s32.totalorder %s78_s0, %s78_s0 }
  0x12   :  { %v29_v10 = vadd.f32 %v27_v6, %v23_v2  ;;  %v33_v11 = vmul.f32 0.01, %v31_v7  ;;  %v30_v12 = vadd.f32 %v28_v8, %v24_v4  ;;  %v34_v13 = vmul.f32 0.01, %v32_v9  ;;  %p85_p8 = por %p84_p7, %p83_p6 }
  0x14   :  { %v35_v14 = vadd.f32 %v33_v11, %v29_v10  ;;  %v36_v15 = vadd.f32 %v34_v13, %v30_v12  ;;  %p86_p9 = pnand %p85_p8, %p79_p5 }
  0x16   :  { %v37_v16 = vadd.f32 0.25, %v35_v14  ;;  %v38_v17 = vadd.f32 0.25, %v36_v15 }
  0x18   :  { %39 = vst [vmem:[#allocation5] sm:$0xff] %v37_v16  ;;  %40 = vst [vmem:[#allocation5 + $0x8] sm:$0xff] %v38_v17 }
  0x19   :  { %89 = shalt.err (!%p86_p9)
}
  0x1a   :  { %50 = dma.vmem_to_hbm [thread:$0]  %s48_s12, 256, %s121_s1, [#allocation4]  }
  0x1b   :  { %100 = dma.done.wait [#allocation4], 256  }
  0x1c   :  { %101 = vsyncadd [#allocation4], 4294967040 }
  0x1d   :  { %54 = vsyncpa [#allocation3], 1 }
  0x1e   :  { %55 = vsyncpa [#allocation4], 1 }

</bundles_post_ra>
